<compile_context>
chip_gen: v7x
topology: tpu7x:2x2x1
jax: 0.10.0
libtpu: 0.0.40
codegen_flags: <defaults>
</compile_context>

<pallas_src>
import jax
import jax.numpy as jnp
from jax.experimental import pallas as pl
from jax.experimental.pallas import tpu as pltpu

IGNORE_INDEX = 255.0


def _seg_loss_kernel(logits_ref, target_ref, stats_ref):
    """Accumulate per-row partial statistics over one (TR, THW) spatial tile.

    stats_ref columns: 0=bce_sum, 1=valid_count, 2=sum(p*t), 3=sum(p*mask),
                       4=sum(t); columns 5..7 unused (zero).
    """
    # The stats block's index_map ignores the spatial grid axis, so it stays
    # resident in VMEM across it: zero it on the first spatial step only.
    @pl.when(pl.program_id(1) == 0)
    def _():
        stats_ref[...] = jnp.zeros_like(stats_ref)

    x = logits_ref[...].astype(jnp.float32)
    t_raw = target_ref[...].astype(jnp.float32)

    valid = t_raw != IGNORE_INDEX
    mask = valid.astype(jnp.float32)
    t = jnp.where(valid, t_raw, 0.0)            # labels, already masked

    # Shared transcendental work: 1 exp + 1 log + 1 approx reciprocal / elem.
    e = jnp.exp(-jnp.abs(x))                    # EUP
    d = 1.0 + e                                 # in (1, 2]
    r = pl.reciprocal(d, approx=True)           # EUP (approx)
    r = r * (2.0 - d * r)                       # Newton step on VPU -> ~f32 exact
    p = jnp.where(x >= 0.0, r, e * r)           # sigmoid(x)

    softplus = jnp.maximum(x, 0.0) + jnp.log(d)  # log1p(e) == log(d), safe here
    bce_elem = (softplus - x * t) * mask         # stable BCE-with-logits

    # Per-row reductions over the spatial (lane) axis.
    bce_row = jnp.sum(bce_elem, axis=-1, keepdims=True)
    cnt_row = jnp.sum(mask, axis=-1, keepdims=True)
    inter_row = jnp.sum(p * t, axis=-1, keepdims=True)   # t already masked
    psum_row = jnp.sum(p * mask, axis=-1, keepdims=True)
    tsum_row = jnp.sum(t, axis=-1, keepdims=True)        # t already masked

    # Scatter the five scalars-per-row into the fused (TR, 8) stats block.
    tr = stats_ref.shape[0]
    col = jax.lax.broadcasted_iota(jnp.int32, (tr, 8), 1)
    zero = jnp.zeros((tr, 8), jnp.float32)
    upd = (jnp.where(col == 0, bce_row, zero)
           + jnp.where(col == 1, cnt_row, zero)
           + jnp.where(col == 2, inter_row, zero)
           + jnp.where(col == 3, psum_row, zero)
           + jnp.where(col == 4, tsum_row, zero))
    stats_ref[...] += upd


def _largest_tile(total, align, cap):
    """Largest multiple of `align` that divides `total` and is <= cap."""
    assert total % align == 0, (total, align)
    cap = max(align, min(int(cap), total))
    best = align
    for t in range(align, cap + 1, align):
        if total % t == 0:
            best = t
    return best


def seg_loss_pallas(output, target, cfg, *, smooth=1.0,
                    max_thw=16384, max_tile_bytes=2 << 20):
    """Pallas implementation of SegLoss.forward.

    output: logits, shape (N, C, H, W)
    target: labels in {0, 1} with 255 = ignore, shape (N, C, H, W)
    Returns dict of scalar losses (bce_loss, optionally dice_loss).
    """
    N, C, H, W = output.shape
    NC, HW = N * C, H * W
    assert NC % 8 == 0 and HW % 128 == 0, "pad N*C to 8 and H*W to 128"

    # Narrow input dtypes (bf16 logits / uint8 labels) would cut HBM traffic
    # further but change the sublane tiling constraints; keep f32 here.
    logits2d = output.reshape(NC, HW).astype(jnp.float32)
    target2d = target.reshape(NC, HW).astype(jnp.float32)

    # VMEM-budgeted tile sizes: per-input tile <= max_tile_bytes (default
    # 2 MiB) => 2 inputs x 2 pipeline buffers ~ 8 MiB, within the v5e 16 MiB
    # scoped default and well under v7x's 64 MiB physical VMEM.
    THW = _largest_tile(HW, 128, max_thw)
    tr_cap = max(8, (max_tile_bytes // 4) // THW)
    if NC >= 16:
        # Keep >= 2 row steps so both v7x TensorCores get parallel work.
        tr_cap = min(tr_cap, NC // 2)
    TR = _largest_tile(NC, 8, tr_cap)

    grid = (NC // TR, HW // THW)   # (parallel rows, spatial reduction last)

    in_spec = pl.BlockSpec((TR, THW), lambda i, j: (i, j))
    out_spec = pl.BlockSpec((TR, 8), lambda i, j: (i, 0))  # resident across j

    cost = pl.CostEstimate(
        flops=16 * NC * HW,
        transcendentals=3 * NC * HW,
        bytes_accessed=2 * NC * HW * 4 + NC * 8 * 4,
    )

    stats = pl.pallas_call(
        _seg_loss_kernel,
        out_shape=jax.ShapeDtypeStruct((NC, 8), jnp.float32),
        grid_spec=pltpu.PrefetchScalarGridSpec(
            num_scalar_prefetch=0,
            grid=grid,
            in_specs=[in_spec, in_spec],
            out_specs=out_spec,
        ),
        compiler_params=pltpu.CompilerParams(
            dimension_semantics=("parallel", "arbitrary")),
        cost_estimate=cost,
    )(logits2d, target2d)

    bce_rows = stats[:, 0]
    cnt_rows = stats[:, 1]
    inter_rows = stats[:, 2]
    psum_rows = stats[:, 3]
    tsum_rows = stats[:, 4]

    loss = {}

    # BCE with ignore_index=255: mean over valid pixels.
    assert 'bce_loss' in cfg
    bce = jnp.sum(bce_rows) / jnp.maximum(jnp.sum(cnt_rows), 1.0)
    loss['bce_loss'] = cfg['bce_loss'] * bce

    if 'dice_loss' in cfg:
        # Multi-label dice: per class, flatten over batch+spatial, mean over C.
        inter_c = inter_rows.reshape(N, C).sum(axis=0)
        psum_c = psum_rows.reshape(N, C).sum(axis=0)
        tsum_c = tsum_rows.reshape(N, C).sum(axis=0)
        dice_c = 1.0 - (2.0 * inter_c + smooth) / (psum_c + tsum_c + smooth)
        loss['dice_loss'] = cfg['dice_loss'] * jnp.mean(dice_c)

    # TODO(synk): 'lovasz_loss' (lovasz_hinge_flat) needs a full sort of the
    # per-pixel errors; not implemented as a Pallas kernel.
    return loss


def _seg_loss_reference(output, target, cfg, *, smooth=1.0):
    """Pure-JAX reference mirroring the PyTorch semantics (naive formulation)."""
    p = jax.nn.sigmoid(output.astype(jnp.float32))
    t_raw = target.astype(jnp.float32)
    valid = t_raw != IGNORE_INDEX
    mask = valid.astype(jnp.float32)
    t = jnp.where(valid, t_raw, 0.0)

    eps = 1e-12
    pc = jnp.clip(p, eps, 1.0 - eps)
    bce_elem = -(t * jnp.log(pc) + (1.0 - t) * jnp.log(1.0 - pc)) * mask
    bce = jnp.sum(bce_elem) / jnp.maximum(jnp.sum(mask), 1.0)

    loss = {'bce_loss': cfg['bce_loss'] * bce}
    if 'dice_loss' in cfg:
        inter = jnp.sum(p * t * mask, axis=(0, 2, 3))
        psum = jnp.sum(p * mask, axis=(0, 2, 3))
        tsum = jnp.sum(t * mask, axis=(0, 2, 3))
        dice_c = 1.0 - (2.0 * inter + smooth) / (psum + tsum + smooth)
        loss['dice_loss'] = cfg['dice_loss'] * jnp.mean(dice_c)
    return loss


if __name__ == "__main__":
    cfg = {'bce_loss': 1.0, 'dice_loss': 0.5}

    N, C, H, W = 2, 4, 16, 16
    key = jax.random.PRNGKey(0)
    k_out, k_tgt, k_ign = jax.random.split(key, 3)

    output = jax.random.normal(k_out, (N, C, H, W), dtype=jnp.float32)
    target = jax.random.bernoulli(k_tgt, 0.4, (N, C, H, W)).astype(jnp.float32)
    # mark ~10% of pixels as ignore_index=255
    ignore = jax.random.bernoulli(k_ign, 0.1, (N, C, H, W))
    target = jnp.where(ignore, jnp.float32(IGNORE_INDEX), target)

    # max_thw=128 forces a multi-step spatial (reduction) grid even at this
    # small test size, exercising the accumulate-across-HW path.
    loss = seg_loss_pallas(output, target, cfg, max_thw=128)
    loss = jax.tree_util.tree_map(jax.block_until_ready, loss)

    ref = _seg_loss_reference(output, target, cfg)
    for k in loss:
        assert jnp.allclose(loss[k], ref[k], rtol=5e-4, atol=1e-5), (
            k, float(loss[k]), float(ref[k]))

    print("KERNEL_OK")
</pallas_src>

<mosaic_0001>
module attributes {stable_mosaic.version = 11 : i64} {
  func.func @_seg_loss_kernel(%arg0: i32, %arg1: i32, %arg2: memref<8x128xf32, #tpu.memory_space<vmem>>, %arg3: memref<8x128xf32, #tpu.memory_space<vmem>>, %arg4: memref<8x8xf32, #tpu.memory_space<vmem>>) attributes {dimension_semantics = [#tpu.dimension_semantics<parallel>, #tpu.dimension_semantics<arbitrary>], iteration_bounds = array<i64: 1, 2>, scalar_prefetch = 0 : i64, scratch_operands = 0 : i64, tpu.core_type = #tpu.core_type<tc>, window_params = [{transform_indices = @transform_0, window_bounds = array<i64: 8, 128>}, {transform_indices = @transform_1, window_bounds = array<i64: 8, 128>}, {transform_indices = @transform_2, window_bounds = array<i64: 8, 8>}]} {
    %c0_i32 = arith.constant 0 : i32
    %0 = arith.cmpi eq, %arg1, %c0_i32 : i32
    %1 = arith.extui %0 : i1 to i32
    %c0_i32_0 = arith.constant 0 : i32
    %2 = arith.cmpi ne, %1, %c0_i32_0 : i32
    scf.if %2 {
      %cst_21 = arith.constant 0.000000e+00 : f32
      %79 = vector.broadcast %cst_21 : f32 to vector<8x8xf32>
      %c0_22 = arith.constant 0 : index
      %c0_23 = arith.constant 0 : index
      %80 = vector.load %arg4[%c0_22, %c0_23] : memref<8x8xf32, #tpu.memory_space<vmem>>, vector<8x8xf32>
      tpu.vector_store %arg4[%c0_22, %c0_23], %79 {strides = array<i32>} : memref<8x8xf32, #tpu.memory_space<vmem>>, vector<8x8xf32>,
    } else {
    }
    %c0 = arith.constant 0 : index
    %c0_1 = arith.constant 0 : index
    %3 = vector.load %arg2[%c0, %c0_1] : memref<8x128xf32, #tpu.memory_space<vmem>>, vector<8x128xf32>
    %c0_2 = arith.constant 0 : index
    %c0_3 = arith.constant 0 : index
    %4 = vector.load %arg3[%c0_2, %c0_3] : memref<8x128xf32, #tpu.memory_space<vmem>>, vector<8x128xf32>
    %cst = arith.constant 2.550000e+02 : f32
    %5 = vector.broadcast %cst : f32 to vector<8x128xf32>
    %6 = arith.cmpf one, %4, %5 : vector<8x128xf32>
    %7 = arith.extui %6 : vector<8x128xi1> to vector<8x128xi32>
    %8 = arith.sitofp %7 : vector<8x128xi32> to vector<8x128xf32>
    %cst_4 = arith.constant 0.000000e+00 : f32
    %9 = vector.broadcast %cst_4 : f32 to vector<8x128xf32>
    %10 = arith.select %6, %4, %9 : vector<8x128xi1>, vector<8x128xf32>
    %11 = math.absf %3 : vector<8x128xf32>
    %cst_5 = arith.constant 0.000000e+00 : f32
    %12 = vector.broadcast %cst_5 : f32 to vector<8x128xf32>
    %13 = arith.subf %12, %11 : vector<8x128xf32>
    %14 = math.exp %13 : vector<8x128xf32>
    %cst_6 = arith.constant 1.000000e+00 : f32
    %15 = vector.broadcast %cst_6 : f32 to vector<8x128xf32>
    %16 = arith.addf %15, %14 : vector<8x128xf32>
    %17 = tpu.reciprocal %16 {approx = true} : vector<8x128xf32> -> vector<8x128xf32>
    %18 = arith.mulf %16, %17 : vector<8x128xf32>
    %cst_7 = arith.constant 2.000000e+00 : f32
    %19 = vector.broadcast %cst_7 : f32 to vector<8x128xf32>
    %20 = arith.subf %19, %18 : vector<8x128xf32>
    %21 = arith.mulf %17, %20 : vector<8x128xf32>
    %cst_8 = arith.constant 0.000000e+00 : f32
    %22 = vector.broadcast %cst_8 : f32 to vector<8x128xf32>
    %23 = arith.cmpf oge, %3, %22 : vector<8x128xf32>
    %24 = arith.mulf %14, %21 : vector<8x128xf32>
    %25 = arith.select %23, %21, %24 : vector<8x128xi1>, vector<8x128xf32>
    %cst_9 = arith.constant 0.000000e+00 : f32
    %26 = vector.broadcast %cst_9 : f32 to vector<8x128xf32>
    %27 = arith.maximumf %3, %26 : vector<8x128xf32>
    %28 = math.log %16 : vector<8x128xf32>
    %29 = arith.addf %27, %28 : vector<8x128xf32>
    %30 = arith.mulf %3, %10 : vector<8x128xf32>
    %31 = arith.subf %29, %30 : vector<8x128xf32>
    %32 = arith.mulf %31, %8 : vector<8x128xf32>
    %cst_10 = arith.constant dense<0.000000e+00> : vector<8xf32>
    %33 = vector.multi_reduction <add>, %32, %cst_10 [1] : vector<8x128xf32> to vector<8xf32>
    %34 = vector.shape_cast %33 : vector<8xf32> to vector<8x1xf32>
    %cst_11 = arith.constant dense<0.000000e+00> : vector<8xf32>
    %35 = vector.multi_reduction <add>, %8, %cst_11 [1] : vector<8x128xf32> to vector<8xf32>
    %36 = vector.shape_cast %35 : vector<8xf32> to vector<8x1xf32>
    %37 = arith.mulf %25, %10 : vector<8x128xf32>
    %cst_12 = arith.constant dense<0.000000e+00> : vector<8xf32>
    %38 = vector.multi_reduction <add>, %37, %cst_12 [1] : vector<8x128xf32> to vector<8xf32>
    %39 = vector.shape_cast %38 : vector<8xf32> to vector<8x1xf32>
    %40 = arith.mulf %25, %8 : vector<8x128xf32>
    %cst_13 = arith.constant dense<0.000000e+00> : vector<8xf32>
    %41 = vector.multi_reduction <add>, %40, %cst_13 [1] : vector<8x128xf32> to vector<8xf32>
    %42 = vector.shape_cast %41 : vector<8xf32> to vector<8x1xf32>
    %cst_14 = arith.constant dense<0.000000e+00> : vector<8xf32>
    %43 = vector.multi_reduction <add>, %10, %cst_14 [1] : vector<8x128xf32> to vector<8xf32>
    %44 = vector.shape_cast %43 : vector<8xf32> to vector<8x1xf32>
    %45 = tpu.iota {dimensions = array<i32: 1>} : vector<8x8xi32>
    %cst_15 = arith.constant 0.000000e+00 : f32
    %46 = vector.broadcast %cst_15 : f32 to vector<8x8xf32>
    %c0_i32_16 = arith.constant 0 : i32
    %47 = vector.broadcast %c0_i32_16 : i32 to vector<8x8xi32>
    %48 = arith.cmpi eq, %45, %47 : vector<8x8xi32>
    %49 = vector.shape_cast %34 : vector<8x1xf32> to vector<8x1xf32>
    %50 = vector.broadcast %49 : vector<8x1xf32> to vector<8x8xf32>
    %51 = arith.select %48, %50, %46 : vector<8x8xi1>, vector<8x8xf32>
    %c1_i32 = arith.constant 1 : i32
    %52 = vector.broadcast %c1_i32 : i32 to vector<8x8xi32>
    %53 = arith.cmpi eq, %45, %52 : vector<8x8xi32>
    %54 = vector.shape_cast %36 : vector<8x1xf32> to vector<8x1xf32>
    %55 = vector.broadcast %54 : vector<8x1xf32> to vector<8x8xf32>
    %56 = arith.select %53, %55, %46 : vector<8x8xi1>, vector<8x8xf32>
    %57 = arith.addf %51, %56 : vector<8x8xf32>
    %c2_i32 = arith.constant 2 : i32
    %58 = vector.broadcast %c2_i32 : i32 to vector<8x8xi32>
    %59 = arith.cmpi eq, %45, %58 : vector<8x8xi32>
    %60 = vector.shape_cast %39 : vector<8x1xf32> to vector<8x1xf32>
    %61 = vector.broadcast %60 : vector<8x1xf32> to vector<8x8xf32>
    %62 = arith.select %59, %61, %46 : vector<8x8xi1>, vector<8x8xf32>
    %63 = arith.addf %57, %62 : vector<8x8xf32>
    %c3_i32 = arith.constant 3 : i32
    %64 = vector.broadcast %c3_i32 : i32 to vector<8x8xi32>
    %65 = arith.cmpi eq, %45, %64 : vector<8x8xi32>
    %66 = vector.shape_cast %42 : vector<8x1xf32> to vector<8x1xf32>
    %67 = vector.broadcast %66 : vector<8x1xf32> to vector<8x8xf32>
    %68 = arith.select %65, %67, %46 : vector<8x8xi1>, vector<8x8xf32>
    %69 = arith.addf %63, %68 : vector<8x8xf32>
    %c4_i32 = arith.constant 4 : i32
    %70 = vector.broadcast %c4_i32 : i32 to vector<8x8xi32>
    %71 = arith.cmpi eq, %45, %70 : vector<8x8xi32>
    %72 = vector.shape_cast %44 : vector<8x1xf32> to vector<8x1xf32>
    %73 = vector.broadcast %72 : vector<8x1xf32> to vector<8x8xf32>
    %74 = arith.select %71, %73, %46 : vector<8x8xi1>, vector<8x8xf32>
    %75 = arith.addf %69, %74 : vector<8x8xf32>
    %c0_17 = arith.constant 0 : index
    %c0_18 = arith.constant 0 : index
    %76 = vector.load %arg4[%c0_17, %c0_18] : memref<8x8xf32, #tpu.memory_space<vmem>>, vector<8x8xf32>
    %77 = arith.addf %76, %75 : vector<8x8xf32>
    %c0_19 = arith.constant 0 : index
    %c0_20 = arith.constant 0 : index
    %78 = vector.load %arg4[%c0_19, %c0_20] : memref<8x8xf32, #tpu.memory_space<vmem>>, vector<8x8xf32>
    tpu.vector_store %arg4[%c0_19, %c0_20], %77 {strides = array<i32>} : memref<8x8xf32, #tpu.memory_space<vmem>>, vector<8x8xf32>,
    return
  }
  func.func @transform_0(%arg0: i32, %arg1: i32) -> (i32, i32) {
    %c0_i32 = arith.constant 0 : i32
    return %arg0, %arg1 : i32, i32
  }
  func.func @transform_1(%arg0: i32, %arg1: i32) -> (i32, i32) {
    %c0_i32 = arith.constant 0 : i32
    return %arg0, %arg1 : i32, i32
  }
  func.func @transform_2(%arg0: i32, %arg1: i32) -> (i32, i32) {
    %c0_i32 = arith.constant 0 : i32
    %c0_i32_0 = arith.constant 0 : i32
    return %arg0, %c0_i32 : i32, i32
  }
}

</mosaic_0001>

<bundles_post_ra>
// kernel: tpu_custom_call.1
= control target key start
LH: loop header
LB: loop body
LE: loop exit
PB: predicated region body
PF: predicated region fallthrough
CT: control target
= control target key end

     0   :  { %7 = vsyncpa [#allocation3], 0  ;;  %s824_s0 = inlined_call_operand.hbm [shape: f32[8,256], index: 0, kind: input, shape index: {}]   ;;  %s825_s1 = inlined_call_operand.hbm [shape: f32[8,256], index: 1, kind: input, shape index: {}]   ;;  %s826_s2 = inlined_call_operand.hbm [shape: f32[8,8], index: 2, kind: output, shape index: {}]  }
   0x1   :  { %9 = vsyncpa [#allocation3 + $0x1], 0 }
   0x2   :  { %10 = vsyncpa [#allocation6], 0 }
   0x3   :  { %12 = vsyncpa [#allocation6 + $0x1], 0 }
   0x4   :  { %13 = vsyncpa [#allocation4], 0  ;;  %s626_s9 = smov 0   ;;  %s628_s10 = smov 0  }
   0x5   :  { %s630_s11 = smov 0   ;;  %s632_s12 = smov 0  }
   0x6   :  { %s634_s13 = smov 0   ;;  %s636_s14 = smov 0  }
   0x7 LB: > { %s369_s15 = sadd.s32 4294967295, %s604_s14   ;;  %s28_s16 = sadd.s32 1, %s600_s13  ;;  %s604_s14 = sphi %s636_s14, %s19_s14   ;;  %s600_s13 = sphi %s634_s13, %s841_s13   ;;  %s596_s12 = sphi %s632_s12, %s840_s12   ;;  %s592_s11 = sphi %s630_s11, %s839_s11   ;;  %s588_s10 = sphi %s628_s10, %s838_s10   ;;  %s584_s9 = sphi %s626_s9, %s837_s9  }
   0x8   : > { %p29_p0 = scmp.ge.s32.totalorder %s28_s16, 2  ;;  %s40_s17 = sadd.s32 1, %s592_s11 }
   0x9   : > { %p47_p1 = scmp.ne.s32.totalorder %s592_s11, %s588_s10  ;;  %p48_p2 = scmp.eq.s32.totalorder %s604_s14, 0 }
   0xa   : > { %s843_s16 = smov (%p29_p0, %s28_s16), 0  ;;  %p53_p4 = scmp.ne.s32.totalorder %s588_s10, %s584_s9 }
   0xb   : > { %p662_p3 = por %p48_p2, %p47_p1  ;;  %s36_s19 = ssub.s32 %s600_s13, %s843_s16 }
   0xc   : > { %p54_p5 = scmp.eq.s32.totalorder %s369_s15, 0  ;;  %p38_p6 = scmp.eq.s32.totalorder %s36_s19, 0 }
   0xd   : > { %p400_p8 = scmp.lt.s32.totalorder %s604_s14, 2  ;;  %s680_s22 = sand.u32 1, %s592_s11  }
   0xe   : > { %p671_p7 = por %p54_p5, %p53_p4  ;;  %s373_s23 = sshll.u32 %s600_s13, 7 }
   0xf   : > { %s677_s21 = scalar_select %p38_p6, %s592_s11, %s40_s17  }
  0x10   : > { %s829_s20 = scalar_select %p671_p7, 1, 0 }
  0x11   : > { %s372_s24 = sshll.u32 %s680_s22, 3  ;;  %s689_s27 = scalar_lea.hbm %s824_s0, %s373_s23 }
  0x12   : > { %s135_s28 = scalar_lea.vmem [#allocation2], %s372_s24  ;;  %p695_p9 = pnand %p400_p8, %p662_p3 }
  0x13   : > { %s144_s29 = sshll.u32 %s135_s28, 4  ;;  %s132_s3 = scalar_lea.sflag [#allocation3], %s680_s22  ;;  %s699_s29 = int_to_ptr.vmem [resolvable:$true] %s144_s29 }
  0x14   : > { %s460_s4 = scalar_lea.hbm %s689_s27, 128  ;;  %p462_p13 = pneg %p695_p9 }
  0x15   : > { %p461_p12 = scmp.ne.s32.totalorder %s689_s27, %s460_s4  ;;  %s465_s7 = scalar_lea.hbm %s824_s0, 256 }
  0x16   : > { %p466_p2 = scmp.lt.u32.totalorder %s689_s27, %s824_s0  ;;  %p467_p3 = scmp.lt.u32.totalorder %s465_s7, %s460_s4 }
  0x17   : > { %p463_p0 = pnand %p462_p13, %p461_p12  ;;  %p469_p5 = scmp.lt.u32.totalorder %s460_s4, %s689_s27 }
  0x18   : > { %p468_p4 = por %p467_p3, %p466_p2 }
  0x19   : > { %p464_p1 = pneg %p463_p0 }
  0x1a   : > { %p470_p6 = por %p469_p5, %p468_p4 }
  0x1c   : > { %p471_p8 = pnand %p470_p6, %p464_p1 }
  0x1e   : > { %474 = shalt.err (!%p471_p8)
}
  0x1f   : > { %s475_s17 = scalar_lea.vmem %s699_s29, 128  ;;  %s606_s18 = smov [#allocation2]  }
  0x20   : > { %p476_p12 = scmp.ne.s32.totalorder %s699_s29, %s475_s17  ;;  %s480_s19 = sshll.u32 %s606_s18, 4  ;;  %s481_s19 = int_to_ptr.vmem [resolvable:$false] %s480_s19 }
  0x21   : > { %s482_s25 = scalar_lea.vmem %s481_s19, 256  ;;  %p483_p11 = scmp.lt.s32.totalorder %s699_s29, %s481_s19 }
  0x22   : > { %p478_p0 = pnand %p476_p12, %p462_p13  ;;  %p484_p2 = scmp.lt.s32.totalorder %s482_s25, %s475_s17 }
  0x24   : > { %p479_p10 = pneg %p478_p0  ;;  %p485_p3 = por %p484_p2, %p483_p11 }
  0x26   : > { %p486_p4 = pnand %p485_p3, %p479_p10 }
  0x28   : > { %489 = shalt.err (!%p486_p4)
}
  0x29   : > { %396 = dma.hbm_to_vmem [thread:$0]  (!%p695_p9), %s689_s27, 128, %s699_s29, %s132_s3  }
  0x2a   : > { %p831_p1 = scmp.lt.s32.totalorder %s604_s14, 3  ;;  %p832_p5 = scmp.ge.s32.totalorder %s604_s14, 1 }
  0x2b   : > { %s742_s5 = scalar_lea.hbm %s825_s1, %s373_s23  ;;  %s155_s6 = scalar_lea.vmem [#allocation5], %s372_s24 }
  0x2c   : > { %p733_p6 = pnand %p832_p5, %p831_p1  ;;  %s164_s7 = sshll.u32 %s155_s6, 4  ;;  %s165_s7 = int_to_ptr.vmem [resolvable:$true] %s164_s7 }
  0x2d   : > { %s152_s27 = scalar_lea.sflag [#allocation6], %s680_s22  ;;  %s490_s29 = scalar_lea.hbm %s742_s5, 128 }
  0x2e   : > { %s833_s26 = scalar_select %p733_p6, 1, 0 }
  0x2f   : > { %p491_p10 = scmp.ne.s32.totalorder %s742_s5, %s490_s29  ;;  %s495_s23 = scalar_lea.hbm %s825_s1, 256 }
  0x30   : > { %p496_p12 = scmp.lt.u32.totalorder %s742_s5, %s825_s1  ;;  %p497_p0 = scmp.lt.u32.totalorder %s495_s23, %s490_s29 }
  0x31   : > { %p493_p11 = pnand %p491_p10, %p462_p13  ;;  %p499_p3 = scmp.lt.u32.totalorder %s490_s29, %s742_s5 }
  0x32   : > { %p498_p2 = por %p497_p0, %p496_p12 }
  0x33   : > { %p494_p8 = pneg %p493_p11 }
  0x34   : > { %p500_p4 = por %p499_p3, %p498_p2 }
  0x36   : > { %p501_p1 = pnand %p500_p4, %p494_p8 }
  0x38   : > { %504 = shalt.err (!%p501_p1)
}
  0x39   : > { %s505_s22 = scalar_lea.vmem %s165_s7, 128  ;;  %s607_s24 = smov [#allocation5]  }
  0x3a   : > { %p506_p5 = scmp.ne.s32.totalorder %s165_s7, %s505_s22  ;;  %s510_s18 = sshll.u32 %s607_s24, 4  ;;  %s511_s18 = int_to_ptr.vmem [resolvable:$false] %s510_s18 }
  0x3b   : > { %s512_s19 = scalar_lea.vmem %s511_s18, 256  ;;  %p513_p7 = scmp.lt.s32.totalorder %s165_s7, %s511_s18 }
  0x3c   : > { %p508_p10 = pnand %p506_p5, %p462_p13  ;;  %p514_p6 = scmp.lt.s32.totalorder %s512_s19, %s505_s22 }
  0x3e   : > { %p509_p11 = pneg %p508_p10  ;;  %p515_p0 = por %p514_p6, %p513_p7 }
  0x40   : > { %p516_p12 = pnand %p515_p0, %p509_p11 }
  0x42   : > { %519 = shalt.err (!%p516_p12)
}
  0x43   : > { %399 = dma.hbm_to_vmem [thread:$0]  (!%p695_p9), %s742_s5, 128, %s165_s7, %s152_s27  }
  0x44   : > { %p834_p8 = scmp.ne.s32.totalorder %s833_s26, 0 }
  0x45   : > { %s175_s25 = sand.u32 (!%p834_p8), 1, %s588_s10   ;;  %p835_p13 = scmp.ne.s32.totalorder (!%p834_p8), %s829_s20, 0 }
  0x46   : > { %173 = sbr.rel (%p834_p8) target bundleno = 300 (0x12c), region = 28  ;;  %s377_s28 = sshll.u32 (!%p834_p8), %s175_s25, 3 }
  0x47   : > { %s176_s4 = scalar_lea.sflag (!%p834_p8), [#allocation3], %s175_s25  ;;  %s179_s6 = scalar_lea.vmem (!%p834_p8), [#allocation2], %s377_s28 }
  0x4d   : > { %571 = dma.done.wait (%p835_p13), %s176_s4, 128  }
  0x4e   : > { %573 = vsyncadd (%p835_p13), %s176_s4, 4294967168  ;;  %s185_s29 = scalar_lea.sflag [#allocation6], %s175_s25  ;;  %s188_s3 = scalar_lea.vmem [#allocation5], %s377_s28 }
  0x4f   : > { %575 = dma.done.wait (%p835_p13), %s185_s29, 128  }
  0x50   : > { %577 = vsyncadd (%p835_p13), %s185_s29, 4294967168  ;;  %p379_p7 = scmp.ne.s32.totalorder %s596_s12, 0 }
  0x51   : > { %vm213_vm0 = vcmask (!%p379_p7), 64512   ;;  %v608_v0 = vmov (!%p379_p7), 0.0  }
  0x52   : > { %212 = sbr.rel (%p379_p7) target bundleno = 89 (0x59), region = 40  ;;  %214 = vst.msk [vmem:[#allocation7] sm:$0xff] (!%p379_p7), %vm213_vm0, %v608_v0 }
  0x59 PF: > { %v215_v1 = vld [vmem:[%s179_s6] sm:$0xff]  ;;  %v216_v7 = vld [vmem:[%s188_s3] sm:$0xff]  ;;  %v609_v16 = vmov 0.0   ;;  %v252_v26 = vlaneseq  ;;  %s610_s12 = smov [#allocation7]   ;;  %vm270_vm8 = vcmask 64512   ;;  %p780_p9 = scmp.eq.s32.totalorder %s369_s15, 1 }
  0x5a   : > { %v221_v2 = vand.u32 2147483647, %v215_v1  ;;  %vm217_vm1 = vcmp.ne.f32.partialorder %v216_v7, 255.0  ;;  %v233_v9 = vmax.f32 %v215_v1, 0.0  ;;  %vm230_vm2 = vcmp.ge.f32.partialorder %v215_v1, 0.0  ;;  %v268_v41 = vld [vmem:[#allocation7] sm:$0xff] }
  0x5b   : > { %v220_v8 = vsel %vm217_vm1, %v216_v7, 0.0  ;;  %v380_v17 = vsel %vm217_vm1, 1.0, %v609_v16  ;;  %v253_v27 = vand.u32 127, %v252_v26  ;;  %s281_s20 = sshll.u32 %s610_s12, 4  ;;  %s282_s20 = int_to_ptr.vmem [resolvable:$true] %s281_s20 }
  0x5c   : > { %v222_v3 = vsub.f32 0.0, %v221_v2  ;;  %v237_v13 = vmul.f32 %v220_v8, %v215_v1  ;;  %s520_s26 = scalar_lea.vmem %s282_s20, 128  ;;  %p527_p4 = scmp.lt.s32.totalorder %s282_s20, %s282_s20 }
  0x5d   : > { %vm254_vm3 = vcmp.eq.s32.totalorder %v253_v27, 0  ;;  %vm256_vm4 = vcmp.eq.s32.totalorder %v253_v27, 1  ;;  %vm259_vm5 = vcmp.eq.s32.totalorder %v253_v27, 2  ;;  %vm262_vm6 = vcmp.eq.s32.totalorder %v253_v27, 3  ;;  %p521_p6 = scmp.ne.s32.totalorder %s282_s20, %s520_s26  ;;  %p528_p1 = scmp.lt.s32.totalorder %s520_s26, %s520_s26 }
  0x5e   : > { %v223_v4 = vmul.f32 1.442695, %v222_v3  ;;  %vm265_vm7 = vcmp.eq.s32.totalorder %v253_v27, 4 }
  0x5f   : > { %p522_p2 = pnand %p521_p6, %p780_p9  ;;  %p529_p5 = por %p528_p1, %p527_p4 }
  0x60   : > { %454 = vpow2.f32 %v223_v4 }
  0x61   : > { %p523_p3 = pneg %p522_p2 }
  0x63   : > { %p530_p10 = pnand %p529_p5, %p523_p3 }
  0x6a   : > { %v455_v5 = vpop.eup %454 }
  0x6b   : > { %v225_v6 = vadd.f32 1.0, %v455_v5 }
  0x6d   : > { %456 = vlog2.f32 %v225_v6 }
  0x6e   : > { %458 = vrcp.f32 %v225_v6 }
  0x77   : > { %v457_v10 = vpop.eup %456 }
  0x78   : > { %v459_v11 = vpop.eup %458  ;;  %v235_v12 = vmul.f32 0.6931472, %v457_v10 }
  0x79   : > { %v227_v14 = vmul.f32 %v459_v11, %v225_v6 }
  0x7a   : > { %v236_v15 = vadd.f32 %v235_v12, %v233_v9 }
  0x7b   : > { %v228_v18 = vsub.f32 2.0, %v227_v14 }
  0x7c   : > { %v238_v19 = vsub.f32 %v236_v15, %v237_v13 }
  0x7d   : > { %v229_v20 = vmul.f32 %v459_v11, %v228_v18 }
  0x7e   : > { %v239_v21 = vmul.f32 %v380_v17, %v238_v19 }
  0x7f   : > { %v231_v22 = vmul.f32 %v455_v5, %v229_v20 }
  0x80   : > { %240 = vadd.xlane.f32.xlu0 %v239_v21 }
  0x81   : > { %v232_v23 = vsel %vm230_vm2, %v229_v20, %v231_v22 }
  0x82   : > { %v244_v24 = vmul.f32 %v232_v23, %v220_v8  ;;  %v247_v25 = vmul.f32 %v380_v17, %v232_v23 }
  0x84   : > { %242 = vadd.xlane.f32.xlu0 %v380_v17  ;;  %245 = vadd.xlane.f32.xlu1 %v244_v24 }
  0x88   : > { %248 = vadd.xlane.f32.xlu1 %v247_v25  ;;  %250 = vadd.xlane.f32.xlu0 %v220_v8 }
 0x10d   : > { %v241_v28 = vpop.xlane.xlu0 %240 }
 0x10e   : > { %v255_v31 = vsel %vm254_vm3, %v241_v28, 0.0 }
 0x111   : > { %v243_v29 = vpop.xlane.xlu0 %242  ;;  %v246_v30 = vpop.xlane.xlu1 %245 }
 0x112   : > { %v257_v32 = vsel %vm256_vm4, %v243_v29, 0.0  ;;  %v260_v34 = vsel %vm259_vm5, %v246_v30, 0.0 }
 0x113   : > { %v258_v33 = vadd.f32 %v257_v32, %v255_v31 }
 0x115   : > { %v261_v35 = vadd.f32 %v260_v34, %v258_v33  ;;  %v249_v36 = vpop.xlane.xlu1 %248  ;;  %v251_v37 = vpop.xlane.xlu0 %250 }
 0x116   : > { %v263_v38 = vsel %vm262_vm6, %v249_v36, 0.0  ;;  %v266_v39 = vsel %vm265_vm7, %v251_v37, 0.0 }
 0x117   : > { %v264_v40 = vadd.f32 %v263_v38, %v261_v35 }
 0x119   : > { %v267_v42 = vadd.f32 %v266_v39, %v264_v40 }
 0x11b   : > { %v269_v43 = vadd.f32 %v268_v41, %v267_v42 }
 0x11d   : > { %271 = vst.msk [vmem:[#allocation7] sm:$0xff] %vm270_vm8, %v269_v43 }
 0x11e   : > { %533 = shalt.err (!%p530_p10)
}
 0x11f   : > { %s534_s15 = scalar_lea.hbm %s826_s2, 128 }
 0x120   : > { %p535_p11 = scmp.ne.s32.totalorder %s826_s2, %s534_s15  ;;  %p540_p8 = scmp.lt.u32.totalorder %s534_s15, %s826_s2 }
 0x122   : > { %p536_p0 = pnand %p535_p11, %p780_p9 }
 0x124   : > { %p537_p12 = pneg %p536_p0 }
 0x126   : > { %p542_p13 = pnand %p540_p8, %p537_p12 }
 0x128   : > { %545 = shalt.err (!%p542_p13)
}
 0x129   : > { %390 = dma.vmem_to_hbm [thread:$0]  (%p780_p9), %s282_s20, 128, %s826_s2, [#allocation4]  }
 0x12a   : > { %579 = dma.done.wait (%p780_p9), [#allocation4], 128  }
 0x12b   : > { %581 = vsyncadd (%p780_p9), [#allocation4], 4294967168 }
 0x12c PF: > { %s19_s14 = sadd.s32 1, %s604_s14   ;;  %s837_s9 = smov %s588_s10 }
 0x12d   : > { %p16_p7 = scmp.ge.s32.totalorder %s19_s14, 4   ;;  %s838_s10 = smov %s592_s11 }
 0x12e   : > { %s839_s11 = smov %s677_s21  ;;  %s840_s12 = smov %s600_s13 }
 0x12f   : > { %s841_s13 = smov %s843_s16  ;;  %18 = sbr.rel (!%p16_p7) target bundleno = 7 (0x7), region = 83 }
 0x136   :  { %294 = vsyncpa [#allocation3], 1 }
 0x137   :  { %296 = vsyncpa [#allocation3 + $0x1], 1 }
 0x138   :  { %297 = vsyncpa [#allocation6], 1 }
 0x139   :  { %299 = vsyncpa [#allocation6 + $0x1], 1 }
 0x13a   :  { %300 = vsyncpa [#allocation4], 1 }
 0x13b   :  { %302 = vsyncpa [#allocation4 + $0x1], 1 }

</bundles_post_ra>
